<compile_context>
chip_gen: v5e
topology: v5e:2x2
jax: 0.10.0
libtpu: 0.0.40
codegen_flags: <defaults>
</compile_context>

<pallas_src>
import functools

import jax
import jax.numpy as jnp
from jax.experimental import pallas as pl
from jax.experimental.pallas import tpu as pltpu


def _round_up(n, m):
    return ((n + m - 1) // m) * m


def _fcnet_kernel(x_ref, w1_ref, b1_ref, w2_ref, b2_ref, w3_ref, b3_ref, o_ref,
                  *, output_gate):
    # Layer 1: bf16 MXU matmul with f32 accumulate; bias + ReLU in f32 (VPU).
    h1 = jnp.dot(x_ref[...].astype(jnp.bfloat16), w1_ref[...],
                 preferred_element_type=jnp.float32)
    h1 = jnp.maximum(h1 + b1_ref[...], 0.0)
    # Layer 2.
    h2 = jnp.dot(h1.astype(jnp.bfloat16), w2_ref[...],
                 preferred_element_type=jnp.float32)
    h2 = jnp.maximum(h2 + b2_ref[...], 0.0)
    # Layer 3 (output columns padded to a lane-dense multiple of 128).
    out = jnp.dot(h2.astype(jnp.bfloat16), w3_ref[...],
                  preferred_element_type=jnp.float32) + b3_ref[...]
    if output_gate == "tanh":
        out = jnp.tanh(out)
    o_ref[...] = out.astype(o_ref.dtype)


def fc_network(x, params, output_gate=None, *, tm_max=2048):
    """Fused forward pass of FCNetwork.

    x: (B, state_size) float32
    params: dict with w1 (S,H1), b1 (1,H1), w2 (H1,H2), b2 (1,H2),
            w3 (H2,O), b3 (1,O) — all float32; weights are cast to bf16 here.
    output_gate: None or "tanh".
    """
    w1 = params["w1"].astype(jnp.bfloat16)
    b1 = params["b1"]
    w2 = params["w2"].astype(jnp.bfloat16)
    b2 = params["b2"]
    w3 = params["w3"]
    b3 = params["b3"]

    B, S = x.shape
    H1 = w1.shape[1]
    H2 = w2.shape[1]
    O = w3.shape[1]

    # Lane-dense output: pad final-layer columns to a multiple of 128 so the
    # output stores are full-width (no masked vst.msk). Padding is free on the
    # MXU (N is padded to 128 anyway) and sliced off below.
    O_pad = _round_up(O, 128)
    if O_pad != O:
        w3 = jnp.pad(w3, ((0, 0), (0, O_pad - O)))
        b3 = jnp.pad(b3, ((0, 0), (0, O_pad - O)))
    w3 = w3.astype(jnp.bfloat16)

    # Batch tiling: TM rows per grid step (multiple of 8, capped so per-step
    # tiles stay well under the 64 MiB v7x VMEM even with double buffering).
    TM = min(tm_max, _round_up(B, 8))
    B_pad = _round_up(B, TM)
    if B_pad != B:
        x = jnp.pad(x, ((0, B_pad - B), (0, 0)))
    grid = (B_pad // TM,)

    kernel = functools.partial(_fcnet_kernel, output_gate=output_gate)

    cost = pl.CostEstimate(
        flops=2 * B_pad * (S * H1 + H1 * H2 + H2 * O_pad),
        transcendentals=B_pad * O_pad if output_gate == "tanh" else 0,
        bytes_accessed=(x.size * x.dtype.itemsize
                        + (w1.size + w2.size + w3.size) * 2
                        + (b1.size + b2.size + b3.size) * 4
                        + B_pad * O_pad * 4),
    )

    out = pl.pallas_call(
        kernel,
        out_shape=jax.ShapeDtypeStruct((B_pad, O_pad), jnp.float32),
        grid=grid,
        in_specs=[
            pl.BlockSpec((TM, S), lambda i: (i, 0)),      # x: tiled over batch
            pl.BlockSpec((S, H1), lambda i: (0, 0)),      # w1: resident
            pl.BlockSpec((1, H1), lambda i: (0, 0)),      # b1: resident
            pl.BlockSpec((H1, H2), lambda i: (0, 0)),     # w2: resident
            pl.BlockSpec((1, H2), lambda i: (0, 0)),      # b2: resident
            pl.BlockSpec((H2, O_pad), lambda i: (0, 0)),  # w3 (padded): resident
            pl.BlockSpec((1, O_pad), lambda i: (0, 0)),   # b3 (padded): resident
        ],
        out_specs=pl.BlockSpec((TM, O_pad), lambda i: (i, 0)),
        compiler_params=pltpu.CompilerParams(
            dimension_semantics=("parallel",)),
        cost_estimate=cost,
    )(x, w1, b1, w2, b2, w3, b3)

    return out[:B, :O]


def init_params(key, state_size, output_size, hidden_size_1, hidden_size_2):
    """Deterministic init mirroring FCNetwork.reset_parameters semantics.

    PyTorch: weight.data.uniform_(-u, u) with u = 1/sqrt(weight.size()[0])
    (weight is (out_features, in_features), so u = 1/sqrt(out_features));
    linear3 weights uniform(-0.003, 0.003). Biases keep nn.Linear default
    uniform(-1/sqrt(in_features), 1/sqrt(in_features)).
    """
    ks = jax.random.split(key, 6)

    def uniform(k, shape, lo, hi):
        return jax.random.uniform(k, shape, jnp.float32, lo, hi)

    u1 = 1.0 / jnp.sqrt(float(hidden_size_1))
    u2 = 1.0 / jnp.sqrt(float(hidden_size_2))
    b1r = 1.0 / jnp.sqrt(float(state_size))
    b2r = 1.0 / jnp.sqrt(float(hidden_size_1))
    b3r = 1.0 / jnp.sqrt(float(hidden_size_2))

    return {
        # stored transposed relative to PyTorch: (in, out)
        "w1": uniform(ks[0], (state_size, hidden_size_1), -u1, u1),
        "b1": uniform(ks[1], (1, hidden_size_1), -b1r, b1r),
        "w2": uniform(ks[2], (hidden_size_1, hidden_size_2), -u2, u2),
        "b2": uniform(ks[3], (1, hidden_size_2), -b2r, b2r),
        "w3": uniform(ks[4], (hidden_size_2, output_size), -0.003, 0.003),
        "b3": uniform(ks[5], (1, output_size), -b3r, b3r),
    }


def fc_network_ref(x, params, output_gate=None):
    """Pure-JAX reference mirroring the kernel's bf16-operand / f32-accumulate math."""
    w1 = params["w1"].astype(jnp.bfloat16)
    w2 = params["w2"].astype(jnp.bfloat16)
    w3 = params["w3"].astype(jnp.bfloat16)
    h1 = jnp.maximum(
        jnp.dot(x.astype(jnp.bfloat16), w1, preferred_element_type=jnp.float32)
        + params["b1"], 0.0)
    h2 = jnp.maximum(
        jnp.dot(h1.astype(jnp.bfloat16), w2, preferred_element_type=jnp.float32)
        + params["b2"], 0.0)
    out = jnp.dot(h2.astype(jnp.bfloat16), w3,
                  preferred_element_type=jnp.float32) + params["b3"]
    if output_gate == "tanh":
        out = jnp.tanh(out)
    return out


if __name__ == "__main__":
    key = jax.random.PRNGKey(0)
    k_x, k_p = jax.random.split(key)

    # Small shapes consistent with the module: state_size=32, hidden=64/64, output=8.
    B, S, H1, H2, O = 16, 32, 64, 64, 8
    x = jax.random.normal(k_x, (B, S), jnp.float32)
    params = init_params(k_p, S, O, H1, H2)

    out = jax.block_until_ready(fc_network(x, params, output_gate=None))
    ref = fc_network_ref(x, params, output_gate=None)
    assert out.shape == (B, O)
    assert jnp.allclose(out, ref, atol=1e-3, rtol=1e-3)

    # Also exercise the optional tanh output gate path.
    out_gated = jax.block_until_ready(fc_network(x, params, output_gate="tanh"))
    ref_gated = fc_network_ref(x, params, output_gate="tanh")
    assert jnp.allclose(out_gated, ref_gated, atol=1e-3, rtol=1e-3)

    # Exercise a batch that needs padding to the 8-row tile multiple.
    x_odd = jax.random.normal(k_x, (13, S), jnp.float32)
    out_odd = jax.block_until_ready(fc_network(x_odd, params))
    assert out_odd.shape == (13, O)
    assert jnp.allclose(out_odd, fc_network_ref(x_odd, params), atol=1e-3, rtol=1e-3)

    print("KERNEL_OK")
</pallas_src>

<mosaic_0001>
module attributes {stable_mosaic.version = 11 : i64} {
  func.func @_fcnet_kernel(%arg0: i32, %arg1: memref<16x32xf32, #tpu.memory_space<vmem>>, %arg2: memref<32x64xbf16, #tpu.memory_space<vmem>>, %arg3: memref<1x64xf32, #tpu.memory_space<vmem>>, %arg4: memref<64x64xbf16, #tpu.memory_space<vmem>>, %arg5: memref<1x64xf32, #tpu.memory_space<vmem>>, %arg6: memref<64x128xbf16, #tpu.memory_space<vmem>>, %arg7: memref<1x128xf32, #tpu.memory_space<vmem>>, %arg8: memref<16x128xf32, #tpu.memory_space<vmem>>) attributes {dimension_semantics = [#tpu.dimension_semantics<parallel>], iteration_bounds = array<i64: 1>, scalar_prefetch = 0 : i64, scratch_operands = 0 : i64, tpu.core_type = #tpu.core_type<tc>, window_params = [{transform_indices = @transform_0, window_bounds = array<i64: 16, 32>}, {pipeline_mode = #tpu.pipeline_mode<synchronous>, transform_indices = @transform_1, window_bounds = array<i64: 32, 64>}, {pipeline_mode = #tpu.pipeline_mode<synchronous>, transform_indices = @transform_2, window_bounds = array<i64: 1, 64>}, {pipeline_mode = #tpu.pipeline_mode<synchronous>, transform_indices = @transform_3, window_bounds = array<i64: 64, 64>}, {pipeline_mode = #tpu.pipeline_mode<synchronous>, transform_indices = @transform_4, window_bounds = array<i64: 1, 64>}, {pipeline_mode = #tpu.pipeline_mode<synchronous>, transform_indices = @transform_5, window_bounds = array<i64: 64, 128>}, {pipeline_mode = #tpu.pipeline_mode<synchronous>, transform_indices = @transform_6, window_bounds = array<i64: 1, 128>}, {transform_indices = @transform_7, window_bounds = array<i64: 16, 128>}]} {
    %c0 = arith.constant 0 : index
    %c0_0 = arith.constant 0 : index
    %0 = vector.load %arg1[%c0, %c0_0] : memref<16x32xf32, #tpu.memory_space<vmem>>, vector<16x32xf32>
    %1 = arith.truncf %0 : vector<16x32xf32> to vector<16x32xbf16>
    %c0_1 = arith.constant 0 : index
    %c0_2 = arith.constant 0 : index
    %2 = vector.load %arg2[%c0_1, %c0_2] : memref<32x64xbf16, #tpu.memory_space<vmem>>, vector<32x64xbf16>
    %cst = arith.constant dense<0.000000e+00> : vector<16x64xf32>
    %3 = tpu.matmul %1, %2, %cst {dimension_numbers = #tpu.dot_dimension_numbers<[1], [0], [0], [1], [0, 0, 1, 1], [], []>} : vector<16x32xbf16>, vector<32x64xbf16>, vector<16x64xf32> -> vector<16x64xf32>
    %c0_3 = arith.constant 0 : index
    %c0_4 = arith.constant 0 : index
    %4 = vector.load %arg3[%c0_3, %c0_4] : memref<1x64xf32, #tpu.memory_space<vmem>>, vector<1x64xf32>
    %5 = vector.broadcast %4 : vector<1x64xf32> to vector<16x64xf32>
    %6 = arith.addf %3, %5 : vector<16x64xf32>
    %cst_5 = arith.constant 0.000000e+00 : f32
    %7 = vector.broadcast %cst_5 : f32 to vector<16x64xf32>
    %8 = arith.maximumf %6, %7 : vector<16x64xf32>
    %9 = arith.truncf %8 : vector<16x64xf32> to vector<16x64xbf16>
    %c0_6 = arith.constant 0 : index
    %c0_7 = arith.constant 0 : index
    %10 = vector.load %arg4[%c0_6, %c0_7] : memref<64x64xbf16, #tpu.memory_space<vmem>>, vector<64x64xbf16>
    %cst_8 = arith.constant dense<0.000000e+00> : vector<16x64xf32>
    %11 = tpu.matmul %9, %10, %cst_8 {dimension_numbers = #tpu.dot_dimension_numbers<[1], [0], [0], [1], [0, 0, 1, 1], [], []>} : vector<16x64xbf16>, vector<64x64xbf16>, vector<16x64xf32> -> vector<16x64xf32>
    %c0_9 = arith.constant 0 : index
    %c0_10 = arith.constant 0 : index
    %12 = vector.load %arg5[%c0_9, %c0_10] : memref<1x64xf32, #tpu.memory_space<vmem>>, vector<1x64xf32>
    %13 = vector.broadcast %12 : vector<1x64xf32> to vector<16x64xf32>
    %14 = arith.addf %11, %13 : vector<16x64xf32>
    %cst_11 = arith.constant 0.000000e+00 : f32
    %15 = vector.broadcast %cst_11 : f32 to vector<16x64xf32>
    %16 = arith.maximumf %14, %15 : vector<16x64xf32>
    %17 = arith.truncf %16 : vector<16x64xf32> to vector<16x64xbf16>
    %c0_12 = arith.constant 0 : index
    %c0_13 = arith.constant 0 : index
    %18 = vector.load %arg6[%c0_12, %c0_13] : memref<64x128xbf16, #tpu.memory_space<vmem>>, vector<64x128xbf16>
    %cst_14 = arith.constant dense<0.000000e+00> : vector<16x128xf32>
    %19 = tpu.matmul %17, %18, %cst_14 {dimension_numbers = #tpu.dot_dimension_numbers<[1], [0], [0], [1], [0, 0, 1, 1], [], []>} : vector<16x64xbf16>, vector<64x128xbf16>, vector<16x128xf32> -> vector<16x128xf32>
    %c0_15 = arith.constant 0 : index
    %c0_16 = arith.constant 0 : index
    %20 = vector.load %arg7[%c0_15, %c0_16] : memref<1x128xf32, #tpu.memory_space<vmem>>, vector<1x128xf32>
    %21 = vector.broadcast %20 : vector<1x128xf32> to vector<16x128xf32>
    %22 = arith.addf %19, %21 : vector<16x128xf32>
    %c0_17 = arith.constant 0 : index
    %c0_18 = arith.constant 0 : index
    %23 = vector.load %arg8[%c0_17, %c0_18] : memref<16x128xf32, #tpu.memory_space<vmem>>, vector<16x128xf32>
    tpu.vector_store %arg8[%c0_17, %c0_18], %22 {strides = array<i32>} : memref<16x128xf32, #tpu.memory_space<vmem>>, vector<16x128xf32>,
    return
  }
  func.func @transform_0(%arg0: i32) -> (i32, i32) {
    %c0_i32 = arith.constant 0 : i32
    %c0_i32_0 = arith.constant 0 : i32
    return %arg0, %c0_i32 : i32, i32
  }
  func.func @transform_1(%arg0: i32) -> (i32, i32) {
    %c0_i32 = arith.constant 0 : i32
    %c0_i32_0 = arith.constant 0 : i32
    %c0_i32_1 = arith.constant 0 : i32
    return %c0_i32, %c0_i32_0 : i32, i32
  }
  func.func @transform_2(%arg0: i32) -> (i32, i32) {
    %c0_i32 = arith.constant 0 : i32
    %c0_i32_0 = arith.constant 0 : i32
    %c0_i32_1 = arith.constant 0 : i32
    return %c0_i32, %c0_i32_0 : i32, i32
  }
  func.func @transform_3(%arg0: i32) -> (i32, i32) {
    %c0_i32 = arith.constant 0 : i32
    %c0_i32_0 = arith.constant 0 : i32
    %c0_i32_1 = arith.constant 0 : i32
    return %c0_i32, %c0_i32_0 : i32, i32
  }
  func.func @transform_4(%arg0: i32) -> (i32, i32) {
    %c0_i32 = arith.constant 0 : i32
    %c0_i32_0 = arith.constant 0 : i32
    %c0_i32_1 = arith.constant 0 : i32
    return %c0_i32, %c0_i32_0 : i32, i32
  }
  func.func @transform_5(%arg0: i32) -> (i32, i32) {
    %c0_i32 = arith.constant 0 : i32
    %c0_i32_0 = arith.constant 0 : i32
    %c0_i32_1 = arith.constant 0 : i32
    return %c0_i32, %c0_i32_0 : i32, i32
  }
  func.func @transform_6(%arg0: i32) -> (i32, i32) {
    %c0_i32 = arith.constant 0 : i32
    %c0_i32_0 = arith.constant 0 : i32
    %c0_i32_1 = arith.constant 0 : i32
    return %c0_i32, %c0_i32_0 : i32, i32
  }
  func.func @transform_7(%arg0: i32) -> (i32, i32) {
    %c0_i32 = arith.constant 0 : i32
    %c0_i32_0 = arith.constant 0 : i32
    return %arg0, %c0_i32 : i32, i32
  }
}

</mosaic_0001>

<bundles_post_ra>
// kernel: tpu_custom_call.1
= control target key start
LH: loop header
LB: loop body
LE: loop exit
PB: predicated region body
PF: predicated region fallthrough
CT: control target
= control target key end

     0   :  { %12 = vsyncpa [#allocation3], 0  ;;  %s542_s0 = inlined_call_operand.hbm [shape: f32[16,32], index: 0, kind: input, shape index: {}]   ;;  %s543_s1 = inlined_call_operand.hbm [shape: bf16[32,64], index: 1, kind: input, shape index: {}]   ;;  %s544_s2 = inlined_call_operand.vmem [shape: f32[1,64], index: 2, kind: input, shape index: {}]   ;;  %s545_s3 = inlined_call_operand.hbm [shape: bf16[64,64], index: 3, kind: input, shape index: {}]   ;;  %s546_s4 = inlined_call_operand.vmem [shape: f32[1,64], index: 4, kind: input, shape index: {}]   ;;  %s547_s5 = inlined_call_operand.hbm [shape: bf16[64,128], index: 5, kind: input, shape index: {}]   ;;  %s548_s6 = inlined_call_operand.vmem [shape: f32[1,128], index: 6, kind: input, shape index: {}]   ;;  %s549_s7 = inlined_call_operand.hbm [shape: f32[16,128], index: 7, kind: output, shape index: {}]  }
   0x1   :  { %13 = vsyncpa [#allocation6], 0 }
   0x2   :  { %14 = vsyncpa [#allocation9], 0  ;;  %s33_s26 = sshll.u32 %s543_s1, 4  ;;  %s34_s26 = int_to_ptr.hbm [resolvable:$true] %s33_s26 }
   0x3   :  { %15 = vsyncpa [#allocation4], 0  ;;  %s461_s27 = smov [#allocation5]   ;;  %s20_s8 = sshll.u32 %s542_s0, 4  ;;  %s21_s8 = int_to_ptr.hbm [resolvable:$true] %s20_s8 }
   0x4   :  { %s35_s28 = sshll.u32 %s461_s27, 4  ;;  %s462_s9 = smov 64   ;;  %s36_s28 = int_to_ptr.vmem [resolvable:$true] %s35_s28 }
   0x5   :  { %s463_s10 = smov 4   ;;  %s464_s11 = smov [#allocation2]  }
   0x6   :  { %41 = dma.hbm_to_vmem [thread:$0]  %s34_s26, 256, %s36_s28, [#allocation6], %s462_s9, %s462_s9, %s463_s10  }
   0x7   :  { %s22_s12 = sshll.u32 %s464_s11, 4  ;;  %s465_s13 = smov 128   ;;  %s23_s12 = int_to_ptr.vmem [resolvable:$true] %s22_s12 }
   0x8   :  { %s466_s14 = smov 8   ;;  %s48_s16 = sshll.u32 %s545_s3, 4  ;;  %s49_s16 = int_to_ptr.hbm [resolvable:$true] %s48_s16 }
   0x9   :  { %28 = dma.hbm_to_vmem [thread:$0]  %s21_s8, 256, %s23_s12, [#allocation3], %s465_s13, %s465_s13, %s466_s14  }
   0xa   :  { %s467_s17 = smov [#allocation7]   ;;  %s63_s20 = sshll.u32 %s547_s5, 4  ;;  %s64_s20 = int_to_ptr.hbm [resolvable:$true] %s63_s20 }
   0xb   :  { %s50_s0 = sshll.u32 %s467_s17, 4  ;;  %s468_s21 = smov [#allocation8]   ;;  %s51_s0 = int_to_ptr.vmem [resolvable:$true] %s50_s0 }
   0xc   :  { %56 = dma.hbm_to_vmem [thread:$0]  %s49_s16, 512, %s51_s0, [#allocation6], %s462_s9, %s462_s9, %s463_s10  }
   0xd   :  { %s65_s22 = sshll.u32 %s468_s21, 4  ;;  %s66_s22 = int_to_ptr.vmem [resolvable:$true] %s65_s22 }
   0xe   :  { %71 = dma.hbm_to_vmem [thread:$0]  %s64_s20, 512, %s66_s22, [#allocation9], %s462_s9, %s462_s9, %s463_s10  }
   0xf   :  { %453 = dma.done.wait [#allocation3], 256  }
  0x10   :  { %454 = vsyncadd [#allocation3], 4294967040 }
  0x11   :  { %455 = dma.done.wait [#allocation6], 768  }
  0x12   :  { %456 = vsyncadd [#allocation6], 4294966528 }
  0x13   :  { %457 = dma.done.wait [#allocation9], 512  }
  0x14   :  { %458 = vsyncadd [#allocation9], 4294966784  ;;  %v312_v0 = vld [vmem:[#allocation5 + $0x8] sm:$0xff]  ;;  %v311_v1 = vld [vmem:[#allocation5] sm:$0xff]  ;;  %vm114_vm0 = vcmask 261120   ;;  %vm171_vm1 = vcmask 523264  }
  0x15   :  { %v91_v2 = vld [vmem:[#allocation2] sm:$0xff]  ;;  %124 = vmatpush.bf16.msra.mxu0 %v312_v0  ;;  %v92_v3 = vld [vmem:[#allocation2 + $0x8] sm:$0xff]  ;;  %v316_v5 = vld [vmem:[#allocation7 + $0x18] sm:$0xff]  ;;  %s469_s26 = smov [#allocation10]  }
  0x16   :  { %v93_v4 = vpack.c.bf16 %v92_v3, %v91_v2  ;;  %179 = vmatpush.bf16.msra.mxu1 %v316_v5  ;;  %v315_v6 = vld [vmem:[#allocation7 + $0x10] sm:$0xff]  ;;  %v314_v7 = vld [vmem:[#allocation7 + $0x8] sm:$0xff]  ;;  %v313_v8 = vld [vmem:[#allocation7] sm:$0xff]  ;;  %s251_s27 = sshll.u32 %s469_s26, 4  ;;  %s252_s27 = int_to_ptr.vmem [resolvable:$true] %s251_s27 }
  0x17   :  { %v330_v10 = vld [vmem:[%s544_s2] ss:$0 sm:$0xff]  ;;  %v320_v17 = vld [vmem:[#allocation8 + $0x18] sm:$0xff]  ;;  %v319_v18 = vld [vmem:[#allocation8 + $0x10] sm:$0xff] }
  0x18   :  { %235 = vmatpush.bf16.msra.mxu2 %v320_v17  ;;  %v318_v19 = vld [vmem:[#allocation8 + $0x8] sm:$0xff]  ;;  %v317_v20 = vld [vmem:[#allocation8] sm:$0xff] }
  0x19   :  { %125 = vmatpush.bf16.msra.mxu0 %v311_v1  ;;  %v331_v22 = vld [vmem:[%s546_s4] ss:$0 sm:$0xff]  ;;  %s253_s4 = sshll.u32 %s549_s7, 4  ;;  %s254_s4 = int_to_ptr.hbm [resolvable:$true] %s253_s4 }
  0x1a   :  { %180 = vmatpush.bf16.msra.mxu1 %v315_v6  ;;  %v332_v29 = vld [vmem:[%s548_s6] ss:$0 sm:$0xff] }
  0x1c   :  { %276 = vmatmul.msk.bf16.vlgmr.msra.gmra.mxu0 %vm114_vm0, %v93_v4  ;;  %236 = vmatpush.bf16.msra.mxu2 %v319_v18 }
  0x1e   :  { %181 = vmatpush.bf16.msra.mxu1 %v314_v7 }
  0x20   :  { %237 = vmatpush.bf16.msra.mxu2 %v318_v19 }
  0x22   :  { %182 = vmatpush.bf16.msra.mxu1 %v313_v8 }
  0x24   :  { %238 = vmatpush.bf16.msra.mxu2 %v317_v20 }
  0x99   :  { %v127_v9 = vpop.f32.mrf.mxu0 }
  0x9a   :  { %v128_v11 = vadd.f32 %v330_v10, %v127_v9 }
  0x9c   :  { %v132_v14 = vmax.f32 %v128_v11, 0.0 }
  0xa1   :  { %v129_v12 = vpop.f32.mrf.mxu0 }
  0xa2   :  { %v130_v13 = vadd.f32 %v330_v10, %v129_v12 }
  0xa4   :  { %v133_v15 = vmax.f32 %v130_v13, 0.0 }
  0xa6   :  { %v134_v16 = vpack.c.bf16 %v133_v15, %v132_v14 }
  0xa8   :  { %293 = vmatmul.msk.bf16.vlgmr.msra.gmra.mxu1 %vm171_vm1, %v134_v16 }
 0x125   :  { %v184_v21 = vpop.f32.mrf.mxu1 }
 0x126   :  { %v185_v23 = vadd.f32 %v331_v22, %v184_v21 }
 0x128   :  { %v189_v26 = vmax.f32 %v185_v23, 0.0 }
 0x12d   :  { %v186_v24 = vpop.f32.mrf.mxu1 }
 0x12e   :  { %v187_v25 = vadd.f32 %v331_v22, %v186_v24 }
 0x130   :  { %v190_v27 = vmax.f32 %v187_v25, 0.0 }
 0x132   :  { %v191_v28 = vpack.c.bf16 %v190_v27, %v189_v26 }
 0x134   :  { %310 = vmatmul.msk.bf16.vlgmr.msra.gmra.mxu2 %vm171_vm1, %v191_v28 }
 0x1b7   :  { %v240_v30 = vpop.f32.mrf.mxu2 }
 0x1b8   :  { %v241_v31 = vadd.f32 %v332_v29, %v240_v30 }
 0x1ba   :  { %245 = vst [vmem:[#allocation10] sm:$0xff] %v241_v31 }
 0x1bf   :  { %v242_v32 = vpop.f32.mrf.mxu2 }
 0x1c0   :  { %v243_v33 = vadd.f32 %v332_v29, %v242_v32 }
 0x1c2   :  { %246 = vst [vmem:[#allocation10 + $0x8] sm:$0xff] %v243_v33 }
 0x1c3   :  { %259 = dma.vmem_to_hbm [thread:$0]  %s252_s27, 256, %s254_s4, [#allocation4], %s465_s13, %s465_s13, %s466_s14  }
 0x1c4   :  { %459 = dma.done.wait [#allocation4], 256  }
 0x1c5   :  { %460 = vsyncadd [#allocation4], 4294967040 }
 0x1c6   :  { %264 = vsyncpa [#allocation3], 1 }
 0x1c7   :  { %265 = vsyncpa [#allocation6], 1 }
 0x1c8   :  { %266 = vsyncpa [#allocation9], 1 }
 0x1c9   :  { %267 = vsyncpa [#allocation4], 1 }

</bundles_post_ra>
